<compile_context>
chip_gen: v7x
topology: tpu7x:2x2x1
jax: 0.10.0
libtpu: 0.0.40
codegen_flags: <defaults>
</compile_context>

<pallas_src>
import math
from functools import partial

import jax
import jax.numpy as jnp
from jax.experimental import pallas as pl
from jax.experimental.pallas import tpu as pltpu


def _attention2d_kernel(scale_ref, x_ref, w1t_ref, w2t_ref, b2_ref,
                        o_ref, acc_ref, *, inv_spatial):
    # scale_ref: (1,) f32 in SMEM  -- 1/temperature
    # x_ref:     (TB, C, TS)       -- current input tile (TS % 128 == 0)
    # w1t_ref:   (C, hidden)       -- fc1 weight, pre-transposed
    # w2t_ref:   (hidden, K)       -- fc2 weight, pre-transposed
    # b2_ref:    (1, K)            -- fc2 bias
    # o_ref:     (TB, K)           -- softmax output for this batch tile
    # acc_ref:   (TB, C, 128) f32  -- lane-group partial-sum accumulator
    s = pl.program_id(1)
    n_s = pl.num_programs(1)

    # ---- init accumulator at the first spatial step of each batch tile ----
    @pl.when(s == 0)
    def _init():
        acc_ref[...] = jnp.zeros_like(acc_ref)

    # ---- accumulate lane-group partial sums (pure VPU adds, no XLU) -------
    ts = x_ref.shape[-1]
    n_groups = ts // 128
    part = x_ref[:, :, 0:128].astype(jnp.float32)
    for g in range(1, n_groups):                       # 128-aligned lane slices
        part = part + x_ref[:, :, g * 128:(g + 1) * 128].astype(jnp.float32)
    acc_ref[...] += part                               # (TB, C, 128)

    # ---- tiny fc1/fc2/softmax epilogue, only on the last spatial step -----
    @pl.when(s == n_s - 1)
    def _finalize():
        # single cross-lane reduce, then mean (zero padding contributes 0)
        pooled = jnp.sum(acc_ref[...], axis=-1) * jnp.float32(inv_spatial)
        h = jnp.dot(pooled, w1t_ref[...].astype(jnp.float32),
                    preferred_element_type=jnp.float32)        # (TB, hidden)
        h = jnp.maximum(h, 0.0)                                # ReLU
        logits = jnp.dot(h, w2t_ref[...].astype(jnp.float32),
                         preferred_element_type=jnp.float32)   # (TB, K)
        logits = logits + b2_ref[...].astype(jnp.float32)
        z = logits * scale_ref[0]                              # logits / T
        z = z - jnp.max(z, axis=-1, keepdims=True)
        e = jnp.exp(z)
        denom = jnp.sum(e, axis=-1, keepdims=True)
        o_ref[...] = (e / denom).astype(o_ref.dtype)           # exact division


def _vmem_limit_bytes():
    """Generation-aware VMEM limit: ~3/4 of physical, capped at 96 MiB."""
    try:
        cap = getattr(pltpu.get_tpu_info(), "vmem_capacity_bytes", None)
    except Exception:
        cap = None
    if not cap:
        cap = 64 * 1024 * 1024          # assume the tightest generation (v7x)
    return int(max(32 * 1024 * 1024, min(cap * 3 // 4, 96 * 1024 * 1024)))


def _choose_tiles(B, C, S_pad, itemsize, batch_tile=None, spatial_tile=None,
                  x_block_budget_bytes=8 << 20):
    """Pick (batch_tile, spatial_tile) satisfying Pallas TPU block rules."""
    # Batch tile: (TB, K) output block needs TB == B or TB % 8 == 0.  Prefer
    # >= 2 batch tiles so the "parallel" axis can use both v7x TensorCores.
    if batch_tile is None:
        tb = 8 if (B % 8 == 0 and B >= 16) else B
    else:
        tb = batch_tile
    assert B % tb == 0 and (tb == B or tb % 8 == 0), (B, tb)

    # Spatial tile: multiple of 128 dividing S_pad, as large as the block
    # budget allows (long contiguous DMA rows), capped to keep the unrolled
    # lane-group accumulation reasonable for tiny C.
    if spatial_tile is None:
        row_bytes = max(1, tb * C * itemsize)
        max_ts = (x_block_budget_bytes // row_bytes) // 128 * 128
        max_ts = min(max_ts, 8192)
        ts = min(S_pad, max(128, max_ts))
        while S_pad % ts != 0:
            ts -= 128
    else:
        ts = spatial_tile
    assert S_pad % ts == 0 and ts % 128 == 0, (S_pad, ts)
    return tb, ts


def attention2d_forward(x, w1, w2, b2, temperature, *,
                        batch_tile=None, spatial_tile=None, x_buffers=2):
    """x: (B, C, H, W) NCHW like PyTorch. Returns (B, K) softmax weights."""
    B, C, H, W = x.shape
    hidden = w1.shape[0]
    K = w2.shape[0]
    S = H * W
    S_pad = ((S + 127) // 128) * 128

    x_flat = x.reshape(B, C, S)
    if S_pad != S:
        # zero padding does not change the spatial sum; mean still uses 1/S
        x_flat = jnp.pad(x_flat, ((0, 0), (0, 0), (0, S_pad - S)))

    w1t = w1.T                          # (C, hidden)  one-time layout fix
    w2t = w2.T                          # (hidden, K)
    b2_2d = b2.reshape(1, K)
    # 1/temperature as an SMEM scalar -> temperature annealing never retraces
    scale = (1.0 / jnp.asarray(temperature, dtype=jnp.float32)).reshape((1,))

    tb, ts = _choose_tiles(B, C, S_pad, x.dtype.itemsize,
                           batch_tile, spatial_tile)
    grid = (B // tb, S_pad // ts)       # (parallel batch, spatial reduction)

    kernel = partial(_attention2d_kernel, inv_spatial=1.0 / float(S))

    x_spec_kwargs = {}
    if x_buffers and x_buffers != 2:
        x_spec_kwargs["pipeline_mode"] = pl.Buffered(x_buffers)
    x_spec = pl.BlockSpec((tb, C, ts), lambda i, s: (i, 0, s), **x_spec_kwargs)

    # Effectively a pure HBM read of x; flops are negligible.
    cost = pl.CostEstimate(
        flops=B * C * S + 2 * B * C * hidden + 2 * B * hidden * K,
        transcendentals=B * K,
        bytes_accessed=(x.size * x.dtype.itemsize
                        + (w1.size + w2.size + b2.size + B * K) * 4),
    )

    return pl.pallas_call(
        kernel,
        out_shape=jax.ShapeDtypeStruct((B, K), jnp.float32),
        grid_spec=pltpu.PrefetchScalarGridSpec(
            num_scalar_prefetch=0,
            grid=grid,
            in_specs=[
                pl.BlockSpec(memory_space=pltpu.MemorySpace.SMEM),    # 1/T
                x_spec,                                               # x tile
                pl.BlockSpec((C, hidden), lambda i, s: (0, 0)),       # w1^T
                pl.BlockSpec((hidden, K), lambda i, s: (0, 0)),       # w2^T
                pl.BlockSpec((1, K), lambda i, s: (0, 0)),            # b2
            ],
            out_specs=pl.BlockSpec((tb, K), lambda i, s: (i, 0)),
            scratch_shapes=[pltpu.VMEM((tb, C, 128), jnp.float32)],
        ),
        compiler_params=pltpu.CompilerParams(
            dimension_semantics=("parallel", "arbitrary"),
            vmem_limit_bytes=_vmem_limit_bytes(),
        ),
        cost_estimate=cost,
    )(scale, x_flat, w1t, w2t, b2_2d)


def init_attention2d_params(key, in_planes, ratios, K):
    """Deterministic kaiming_normal_(mode='fan_out') init, matching __init__."""
    if in_planes != 3:
        hidden_planes = int(in_planes * ratios) + 1
    else:
        hidden_planes = K
    k1, k2 = jax.random.split(key)
    # Conv2d(in, out, 1): weight (out, in, 1, 1); fan_out = out * 1 * 1.
    std1 = math.sqrt(2.0 / hidden_planes)
    std2 = math.sqrt(2.0 / K)
    w1 = std1 * jax.random.normal(k1, (hidden_planes, in_planes), jnp.float32)
    w2 = std2 * jax.random.normal(k2, (K, hidden_planes), jnp.float32)
    b2 = jnp.zeros((K,), jnp.float32)
    return w1, w2, b2, hidden_planes


def _reference_forward(x, w1, w2, b2, temperature):
    pooled = jnp.mean(x, axis=(2, 3))
    h = jax.nn.relu(pooled @ w1.T)
    logits = h @ w2.T + b2
    return jax.nn.softmax(logits / temperature, axis=1)


def _run_and_check(key, B, C, H, W, ratios, K, temperature, **tile_kwargs):
    kx, kp = jax.random.split(key)
    x = jax.random.normal(kx, (B, C, H, W), jnp.float32)
    w1, w2, b2, _ = init_attention2d_params(kp, C, ratios, K)

    out = attention2d_forward(x, w1, w2, b2, temperature, **tile_kwargs)
    out = jax.block_until_ready(out)

    ref = _reference_forward(x, w1, w2, b2, temperature)
    assert out.shape == (B, K)
    assert jnp.allclose(out, ref, atol=2e-3, rtol=2e-3), \
        float(jnp.max(jnp.abs(out - ref)))
    # exact softmax division -> rows sum to 1 within f32 rounding
    assert jnp.allclose(jnp.sum(out, axis=1), 1.0, atol=1e-4)
    return out


if __name__ == "__main__":
    key = jax.random.PRNGKey(0)
    k1, k2, k3 = jax.random.split(key, 3)

    # grid = (1, 2): exercises the tiled spatial reduction.
    _run_and_check(k1, B=2, C=4, H=16, W=16, ratios=0.25, K=4, temperature=4,
                   spatial_tile=128)

    # grid = (2, 4): two batch tiles (parallel axis) x 4-step spatial reduce.
    _run_and_check(k2, B=16, C=16, H=32, W=32, ratios=0.25, K=8, temperature=7,
                   batch_tile=8, spatial_tile=256)

    # S = 100 (not a multiple of 128): exercises zero-padding path; also the
    # in_planes == 3 -> hidden_planes == K branch of the module.
    _run_and_check(k3, B=2, C=3, H=10, W=10, ratios=0.25, K=4, temperature=1)

    print("KERNEL_OK")
</pallas_src>

<mosaic_0001>
module attributes {stable_mosaic.version = 11 : i64} {
  func.func @_attention2d_kernel(%arg0: i32, %arg1: i32, %arg2: memref<1xf32, #tpu.memory_space<smem>>, %arg3: memref<2x4x128xf32, #tpu.memory_space<vmem>>, %arg4: memref<4x2xf32, #tpu.memory_space<vmem>>, %arg5: memref<2x4xf32, #tpu.memory_space<vmem>>, %arg6: memref<1x4xf32, #tpu.memory_space<vmem>>, %arg7: memref<2x4xf32, #tpu.memory_space<vmem>>, %arg8: memref<2x4x128xf32, #tpu.memory_space<vmem>>) attributes {dimension_semantics = [#tpu.dimension_semantics<parallel>, #tpu.dimension_semantics<arbitrary>], iteration_bounds = array<i64: 1, 2>, scalar_prefetch = 0 : i64, scratch_operands = 1 : i64, tpu.core_type = #tpu.core_type<tc>, window_params = [{transform_indices = @transform_0, window_bounds = array<i64: 1>}, {transform_indices = @transform_1, window_bounds = array<i64: 2, 4, 128>}, {pipeline_mode = #tpu.pipeline_mode<synchronous>, transform_indices = @transform_2, window_bounds = array<i64: 4, 2>}, {pipeline_mode = #tpu.pipeline_mode<synchronous>, transform_indices = @transform_3, window_bounds = array<i64: 2, 4>}, {pipeline_mode = #tpu.pipeline_mode<synchronous>, transform_indices = @transform_4, window_bounds = array<i64: 1, 4>}, {transform_indices = @transform_5, window_bounds = array<i64: 2, 4>}]} {
    %c0_i32 = arith.constant 0 : i32
    %0 = arith.cmpi eq, %arg1, %c0_i32 : i32
    %1 = arith.extui %0 : i1 to i32
    %c0_i32_0 = arith.constant 0 : i32
    %2 = arith.cmpi ne, %1, %c0_i32_0 : i32
    scf.if %2 {
      %cst = arith.constant 0.000000e+00 : f32
      %10 = vector.broadcast %cst : f32 to vector<2x4x128xf32>
      %c0_10 = arith.constant 0 : index
      %c0_11 = arith.constant 0 : index
      %c0_12 = arith.constant 0 : index
      %11 = vector.load %arg8[%c0_10, %c0_11, %c0_12] : memref<2x4x128xf32, #tpu.memory_space<vmem>>, vector<2x4x128xf32>
      tpu.vector_store %arg8[%c0_10, %c0_11, %c0_12], %10 {strides = array<i32>} : memref<2x4x128xf32, #tpu.memory_space<vmem>>, vector<2x4x128xf32>,
    } else {
    }
    %c0 = arith.constant 0 : index
    %c0_1 = arith.constant 0 : index
    %c0_2 = arith.constant 0 : index
    %3 = vector.load %arg3[%c0, %c0_1, %c0_2] : memref<2x4x128xf32, #tpu.memory_space<vmem>>, vector<2x4x128xf32>
    %c0_3 = arith.constant 0 : index
    %c0_4 = arith.constant 0 : index
    %c0_5 = arith.constant 0 : index
    %4 = vector.load %arg8[%c0_3, %c0_4, %c0_5] : memref<2x4x128xf32, #tpu.memory_space<vmem>>, vector<2x4x128xf32>
    %5 = arith.addf %4, %3 : vector<2x4x128xf32>
    %c0_6 = arith.constant 0 : index
    %c0_7 = arith.constant 0 : index
    %c0_8 = arith.constant 0 : index
    %6 = vector.load %arg8[%c0_6, %c0_7, %c0_8] : memref<2x4x128xf32, #tpu.memory_space<vmem>>, vector<2x4x128xf32>
    tpu.vector_store %arg8[%c0_6, %c0_7, %c0_8], %5 {strides = array<i32>} : memref<2x4x128xf32, #tpu.memory_space<vmem>>, vector<2x4x128xf32>,
    %c1_i32 = arith.constant 1 : i32
    %7 = arith.cmpi eq, %arg1, %c1_i32 : i32
    %8 = arith.extui %7 : i1 to i32
    %c0_i32_9 = arith.constant 0 : i32
    %9 = arith.cmpi ne, %8, %c0_i32_9 : i32
    scf.if %9 {
      %c0_10 = arith.constant 0 : index
      %c0_11 = arith.constant 0 : index
      %c0_12 = arith.constant 0 : index
      %10 = vector.load %arg8[%c0_10, %c0_11, %c0_12] : memref<2x4x128xf32, #tpu.memory_space<vmem>>, vector<2x4x128xf32>
      %cst = arith.constant dense<0.000000e+00> : vector<2x4xf32>
      %11 = vector.multi_reduction <add>, %10, %cst [2] : vector<2x4x128xf32> to vector<2x4xf32>
      %cst_13 = arith.constant 3.906250e-03 : f32
      %12 = vector.broadcast %cst_13 : f32 to vector<2x4xf32>
      %13 = arith.mulf %11, %12 : vector<2x4xf32>
      %c0_14 = arith.constant 0 : index
      %c0_15 = arith.constant 0 : index
      %14 = vector.load %arg4[%c0_14, %c0_15] : memref<4x2xf32, #tpu.memory_space<vmem>>, vector<4x2xf32>
      %cst_16 = arith.constant dense<0.000000e+00> : vector<2x2xf32>
      %15 = tpu.matmul %13, %14, %cst_16 {dimension_numbers = #tpu.dot_dimension_numbers<[1], [0], [0], [1], [0, 0, 1, 1], [], []>} : vector<2x4xf32>, vector<4x2xf32>, vector<2x2xf32> -> vector<2x2xf32>
      %cst_17 = arith.constant 0.000000e+00 : f32
      %16 = vector.broadcast %cst_17 : f32 to vector<2x2xf32>
      %17 = arith.maximumf %15, %16 : vector<2x2xf32>
      %c0_18 = arith.constant 0 : index
      %c0_19 = arith.constant 0 : index
      %18 = vector.load %arg5[%c0_18, %c0_19] : memref<2x4xf32, #tpu.memory_space<vmem>>, vector<2x4xf32>
      %cst_20 = arith.constant dense<0.000000e+00> : vector<2x4xf32>
      %19 = tpu.matmul %17, %18, %cst_20 {dimension_numbers = #tpu.dot_dimension_numbers<[1], [0], [0], [1], [0, 0, 1, 1], [], []>} : vector<2x2xf32>, vector<2x4xf32>, vector<2x4xf32> -> vector<2x4xf32>
      %c0_21 = arith.constant 0 : index
      %c0_22 = arith.constant 0 : index
      %20 = vector.load %arg6[%c0_21, %c0_22] : memref<1x4xf32, #tpu.memory_space<vmem>>, vector<1x4xf32>
      %21 = vector.broadcast %20 : vector<1x4xf32> to vector<2x4xf32>
      %22 = arith.addf %19, %21 : vector<2x4xf32>
      %c0_23 = arith.constant 0 : index
      %23 = memref.load %arg2[%c0_23] : memref<1xf32, #tpu.memory_space<smem>>
      %24 = vector.broadcast %23 : f32 to vector<2x4xf32>
      %25 = arith.mulf %22, %24 : vector<2x4xf32>
      %cst_24 = arith.constant dense<0xFF800000> : vector<2xf32>
      %26 = vector.multi_reduction <maximumf>, %25, %cst_24 [1] : vector<2x4xf32> to vector<2xf32>
      %27 = vector.shape_cast %26 : vector<2xf32> to vector<2x1xf32>
      %28 = vector.broadcast %27 : vector<2x1xf32> to vector<2x4xf32>
      %29 = arith.subf %25, %28 : vector<2x4xf32>
      %30 = math.exp %29 : vector<2x4xf32>
      %cst_25 = arith.constant dense<0.000000e+00> : vector<2xf32>
      %31 = vector.multi_reduction <add>, %30, %cst_25 [1] : vector<2x4xf32> to vector<2xf32>
      %32 = vector.shape_cast %31 : vector<2xf32> to vector<2x1xf32>
      %33 = vector.broadcast %32 : vector<2x1xf32> to vector<2x4xf32>
      %34 = arith.divf %30, %33 : vector<2x4xf32>
      %c0_26 = arith.constant 0 : index
      %c0_27 = arith.constant 0 : index
      %35 = vector.load %arg7[%c0_26, %c0_27] : memref<2x4xf32, #tpu.memory_space<vmem>>, vector<2x4xf32>
      tpu.vector_store %arg7[%c0_26, %c0_27], %34 {strides = array<i32>} : memref<2x4xf32, #tpu.memory_space<vmem>>, vector<2x4xf32>,
    } else {
    }
    return
  }
  func.func @transform_0(%arg0: i32, %arg1: i32) -> i32 {
    %c0_i32 = arith.constant 0 : i32
    %c0_i32_0 = arith.constant 0 : i32
    return %c0_i32 : i32
  }
  func.func @transform_1(%arg0: i32, %arg1: i32) -> (i32, i32, i32) {
    %c0_i32 = arith.constant 0 : i32
    %c0_i32_0 = arith.constant 0 : i32
    return %arg0, %c0_i32, %arg1 : i32, i32, i32
  }
  func.func @transform_2(%arg0: i32, %arg1: i32) -> (i32, i32) {
    %c0_i32 = arith.constant 0 : i32
    %c0_i32_0 = arith.constant 0 : i32
    %c0_i32_1 = arith.constant 0 : i32
    return %c0_i32, %c0_i32_0 : i32, i32
  }
  func.func @transform_3(%arg0: i32, %arg1: i32) -> (i32, i32) {
    %c0_i32 = arith.constant 0 : i32
    %c0_i32_0 = arith.constant 0 : i32
    %c0_i32_1 = arith.constant 0 : i32
    return %c0_i32, %c0_i32_0 : i32, i32
  }
  func.func @transform_4(%arg0: i32, %arg1: i32) -> (i32, i32) {
    %c0_i32 = arith.constant 0 : i32
    %c0_i32_0 = arith.constant 0 : i32
    %c0_i32_1 = arith.constant 0 : i32
    return %c0_i32, %c0_i32_0 : i32, i32
  }
  func.func @transform_5(%arg0: i32, %arg1: i32) -> (i32, i32) {
    %c0_i32 = arith.constant 0 : i32
    %c0_i32_0 = arith.constant 0 : i32
    return %arg0, %c0_i32 : i32, i32
  }
}

</mosaic_0001>

<bundles_post_ra>
// kernel: tpu_custom_call.1
= control target key start
LH: loop header
LB: loop body
LE: loop exit
PB: predicated region body
PF: predicated region fallthrough
CT: control target
= control target key end

     0   :  { %s968_s0 = inlined_call_operand.<no memory space> [shape: f32[1], index: 0, kind: input, shape index: {}]   ;;  %s969_s1 = inlined_call_operand.hbm [shape: f32[2,4,256], index: 1, kind: input, shape index: {}]   ;;  %s970_s2 = inlined_call_operand.vmem [shape: f32[4,2], index: 2, kind: input, shape index: {}]   ;;  %s971_s3 = inlined_call_operand.vmem [shape: f32[2,4], index: 3, kind: input, shape index: {}]   ;;  %s972_s4 = inlined_call_operand.vmem [shape: f32[1,4], index: 4, kind: input, shape index: {}]   ;;  %s973_s5 = inlined_call_operand.hbm [shape: f32[2,4], index: 5, kind: output, shape index: {}]  }
   0x1   :  { %10 = sst [smem:[#allocation3]] %s968_s0 }
   0x2   :  { %11 = vsyncpa [#allocation5], 0 }
   0x3   :  { %13 = vsyncpa [#allocation5 + $0x1], 0 }
   0x4   :  { %14 = vsyncpa [#allocation6], 0  ;;  %s806_s20 = smov 0   ;;  %s808_s21 = smov 0  }
   0x5   :  { %s810_s22 = smov 0   ;;  %s812_s23 = smov 0  }
   0x6   :  { %s814_s24 = smov 0   ;;  %s816_s25 = smov 0  }
   0x7 LB: > { %s549_s0 = sadd.s32 4294967295, %s763_s25   ;;  %s29_s26 = sadd.s32 1, %s759_s24  ;;  %s763_s25 = sphi %s816_s25, %s20_s25   ;;  %s759_s24 = sphi %s814_s24, %s983_s24   ;;  %s755_s23 = sphi %s812_s23, %s982_s23   ;;  %s751_s22 = sphi %s810_s22, %s981_s22   ;;  %s747_s21 = sphi %s808_s21, %s980_s21   ;;  %s743_s20 = sphi %s806_s20, %s979_s20  }
   0x8   : > { %p30_p0 = scmp.ge.s32.totalorder %s29_s26, 2  ;;  %s62_s27 = sadd.s32 1, %s751_s22 }
   0x9   : > { %p69_p1 = scmp.ne.s32.totalorder %s751_s22, %s747_s21  ;;  %p70_p2 = scmp.eq.s32.totalorder %s763_s25, 0 }
   0xa   : > { %s985_s26 = smov (%p30_p0, %s29_s26), 0  ;;  %p75_p4 = scmp.ne.s32.totalorder %s747_s21, %s743_s20 }
   0xb   : > { %p842_p3 = por %p70_p2, %p69_p1  ;;  %s58_s29 = ssub.s32 %s759_s24, %s985_s26 }
   0xc   : > { %p76_p5 = scmp.eq.s32.totalorder %s549_s0, 0  ;;  %p60_p6 = scmp.eq.s32.totalorder %s58_s29, 0 }
   0xd   : > { %p591_p8 = scmp.lt.s32.totalorder %s763_s25, 2  ;;  %s200_s7 = sand.u32 1, %s751_s22  }
   0xe   : > { %p851_p7 = por %p76_p5, %p75_p4  ;;  %s553_s8 = sshll.u32 %s759_s24, 6 }
   0xf   : > { %s857_s6 = scalar_select %p60_p6, %s751_s22, %s62_s27  }
  0x10   : > { %s552_s9 = sshll.u32 %s200_s7, 3  ;;  %s864_s12 = scalar_lea.hbm %s969_s1, %s553_s8 }
  0x11   : > { %s204_s13 = scalar_lea.vmem [#allocation4], %s552_s9  ;;  %p868_p9 = pnand %p591_p8, %p842_p3 }
  0x12   : > { %s213_s14 = sshll.u32 %s204_s13, 4  ;;  %s875_s16 = scalar_lea.sflag [#allocation5], %s200_s7  ;;  %s872_s14 = int_to_ptr.vmem [resolvable:$true] %s213_s14 }
  0x13   : > { %s653_s17 = scalar_lea.hbm %s864_s12, 128  ;;  %p655_p12 = pneg %p868_p9 }
  0x14   : > { %p654_p11 = scmp.ne.s32.totalorder %s864_s12, %s653_s17  ;;  %s658_s20 = scalar_lea.hbm %s969_s1, 256 }
  0x15   : > { %p659_p1 = scmp.lt.u32.totalorder %s864_s12, %s969_s1  ;;  %p660_p2 = scmp.lt.u32.totalorder %s658_s20, %s653_s17 }
  0x16   : > { %p656_p13 = pnand %p655_p12, %p654_p11  ;;  %p662_p4 = scmp.lt.u32.totalorder %s653_s17, %s864_s12 }
  0x17   : > { %p661_p3 = por %p660_p2, %p659_p1 }
  0x18   : > { %p657_p0 = pneg %p656_p13 }
  0x19   : > { %p663_p5 = por %p662_p4, %p661_p3 }
  0x1b   : > { %p664_p6 = pnand %p663_p5, %p657_p0 }
  0x1d   : > { %667 = shalt.err (!%p664_p6)
}
  0x1e   : > { %s668_s29 = scalar_lea.vmem %s872_s14, 128  ;;  %s765_s7 = smov [#allocation4]  }
  0x1f   : > { %p669_p8 = scmp.ne.s32.totalorder %s872_s14, %s668_s29  ;;  %s673_s8 = sshll.u32 %s765_s7, 4  ;;  %s674_s8 = int_to_ptr.vmem [resolvable:$false] %s673_s8 }
  0x20   : > { %s675_s9 = scalar_lea.vmem %s674_s8, 256  ;;  %p676_p10 = scmp.lt.s32.totalorder %s872_s14, %s674_s8 }
  0x21   : > { %p671_p11 = pnand %p669_p8, %p655_p12  ;;  %p677_p1 = scmp.lt.s32.totalorder %s675_s9, %s668_s29 }
  0x23   : > { %p672_p13 = pneg %p671_p11  ;;  %p678_p2 = por %p677_p1, %p676_p10 }
  0x25   : > { %p679_p3 = pnand %p678_p2, %p672_p13 }
  0x27   : > { %682 = shalt.err (!%p679_p3)
}
  0x28   : > { %s766_s10 = smov 128   ;;  %s767_s11 = smov 64  }
  0x29   : > { %s768_s13 = smov 4   ;;  %p221_p12 = scmp.lt.s32.totalorder %s763_s25, 3 }
  0x2a   : > { %590 = dma.hbm_to_vmem [thread:$0]  (!%p868_p9), %s864_s12, 128, %s872_s14, %s875_s16, %s766_s10, %s767_s11, %s768_s13  }
  0x2b   : > { %p977_p0 = scmp.ge.s32.totalorder %s763_s25, 1 }
  0x2d   : > { %p222_p4 = pnand %p977_p0, %p221_p12 }
  0x2e   : > { %s227_s17 = sand.u32 (!%p222_p4), 1, %s747_s21  }
  0x2f   : > { %225 = sbr.rel (%p222_p4) target bundleno = 997 (0x3e5), region = 40  ;;  %s555_s18 = sshll.u32 (!%p222_p4), %s227_s17, 3 }
  0x30   : > { %s228_s19 = scalar_lea.sflag (!%p222_p4), [#allocation5], %s227_s17  ;;  %s231_s20 = scalar_lea.vmem (!%p222_p4), [#allocation4], %s555_s18 }
  0x36   : > { %734 = dma.done.wait (%p851_p7), %s228_s19, 128  }
  0x37   : > { %736 = vsyncadd (%p851_p7), %s228_s19, 4294967168  ;;  %p556_p10 = scmp.ne.s32.totalorder %s755_s23, 0 }
  0x38   : > { %v769_v0 = vmov (!%p556_p10), 0.0  }
  0x39   : > { %257 = sbr.rel (%p556_p10) target bundleno = 64 (0x40), region = 48  ;;  %258 = vst [vmem:[#allocation2] sm:$0xf] (!%p556_p10), %v769_v0  ;;  %259 = vst [vmem:[#allocation2 + $0x4] sm:$0xf] (!%p556_p10), %v769_v0 }
  0x40 PF: > { %v260_v1 = vld [vmem:[%s231_s20] sm:$0xf]  ;;  %v262_v2 = vld [vmem:[#allocation2] sm:$0xf]  ;;  %v261_v3 = vld [vmem:[%s231_s20 + $0x4] sm:$0xf] }
  0x41   : > { %v264_v4 = vadd.f32 %v262_v2, %v260_v1  ;;  %v263_v5 = vld [vmem:[#allocation2 + $0x4] sm:$0xf]  ;;  %p557_p9 = scmp.ne.s32.totalorder %s755_s23, 1 }
  0x42   : > { %v265_v6 = vadd.f32 %v263_v5, %v261_v3  ;;  %vm274_vm0 = vcmask (!%p557_p9), 1043456   ;;  %v283_v11 = vld [vmem:[%s970_s2] sm:$0xf] (!%p557_p9)  ;;  %v770_v12 = vmov (!%p557_p9), 0.0   ;;  %vm771_vm1 = vmmov (!%p557_p9), 0   ;;  %s461_s15 = sld [smem:[#allocation3]] (!%p557_p9) }
  0x43   : > { %266 = vst [vmem:[#allocation2] sm:$0xf] %v264_v4  ;;  %271 = sbr.rel (%p557_p9) target bundleno = 972 (0x3cc), region = 52  ;;  %571 = vmatprep.subr.mxu0 (!%p557_p9), %v770_v12  ;;  %573 = vmatprep.mubr.msk.f32.mxu0 (!%p557_p9), %vm771_vm1, %v770_v12  ;;  %v286_v13 = vlaneseq (!%p557_p9)  ;;  %vm296_vm2 = vcmask (!%p557_p9), 1041409   ;;  %vm298_vm3 = vcmask (!%p557_p9), 31744   ;;  %vm387_vm4 = vcmask (!%p557_p9), 1041408  }
  0x44   : > { %267 = vst [vmem:[#allocation2 + $0x4] sm:$0xf] %v265_v6  ;;  %572 = vmatpush3.msk.msra.mxu0 (!%p557_p9), %vm274_vm0, %v283_v11  ;;  %576 = vmatprep.subr.mxu1 (!%p557_p9), %v770_v12  ;;  %v375_v24 = vld [vmem:[%s971_s3] sm:$0x3] (!%p557_p9)  ;;  %vm383_vm5 = vcmask (!%p557_p9), 15360   ;;  %vm464_vm6 = vcmask (!%p557_p9), 25600  }
  0x45   : > { %578 = vmatprep.mubr.msk.f32.mxu1 (!%p557_p9), %vm771_vm1, %v770_v12  ;;  %v287_v14 = vand.u32 (!%p557_p9), 127, %v286_v13  ;;  %v289_v15 = vshrl.u32 (!%p557_p9), %v286_v13, 7  ;;  %577 = vmatpush3.msk.msra.mxu1 (!%p557_p9), %vm387_vm4, %v375_v24  ;;  %v560_v28 = vld [vmem:[%s972_s4] ss:$0 sm:$0xff] (!%p557_p9) }
  0x47   : > { %v290_v17 = vsub.s32 (!%p557_p9), %v287_v14, %v289_v15 }
  0x48   : > { %v462_v30 = vstv (!%p557_p9), %s461_s15 }
  0x4a   : > { %v272_v7 = vld [vmem:[#allocation2] sm:$0xf] }
  0x4b   : > { %v273_v8 = vld [vmem:[#allocation2 + $0x4] sm:$0xf]  ;;  %v275_v9 = vsel %vm274_vm0, %v272_v7, 0.0 }
  0x4c   : > { %276 = vadd.xlane.f32.xlu0 %v275_v9  ;;  %v278_v10 = vsel %vm274_vm0, %v273_v8, 0.0 }
  0x50   : > { %279 = vadd.xlane.f32.xlu0 %v278_v10 }
  0xd9   : > { %v277_v16 = vpop.xlane.xlu0 %276 }
  0xda   : > { %v281_v18 = vmul.f32 0.00390625, %v277_v16 }
  0xdc   : > { %v291_v21 = vrot.slane %v281_v18, %v290_v17 }
  0xdd   : > { %v280_v19 = vpop.xlane.xlu0 %279 }
  0xde   : > { %v282_v20 = vmul.f32 0.00390625, %v280_v19 }
  0xe0   : > { %v295_v22 = vrot.slane %v282_v20, %v290_v17 }
  0xe2   : > { %v297_v23 = vsel %vm296_vm2, %v295_v22, %v291_v21 }
  0xe3   : > { %574 = vmatmul.mubr.msk.f32.vlgmr.msra.gmra.mrb[0].mxu0 %vm298_vm3, %v297_v23 }
 0x1b6   : > { %v370_v25 = vpop.f32.mrb[0].mxu0 }
 0x1b7   : > { %v374_v26 = vmax.f32 %v370_v25, 0.0  ;;  %v575_v27 = vpop.f32.mrb[1].mxu0 }
 0x1b9   : > { %579 = vmatmul.mubr.msk.f32.vlgmr.msra.gmra.mrb[0].mxu1 %vm383_vm5, %v374_v26 }
 0x28c   : > { %v457_v29 = vpop.f32.mrb[0].mxu1 }
 0x28d   : > { %v458_v31 = vadd.f32 %v560_v28, %v457_v29  ;;  %v580_v32 = vpop.f32.mrb[1].mxu1 }
 0x28f   : > { %v463_v33 = vmul.f32 %v462_v30, %v458_v31 }
 0x291   : > { %v465_v34 = vsel %vm464_vm6, %v463_v33, -inf }
 0x292   : > { %466 = vmax.xlane.f32.xlu1 %v465_v34 }
 0x31f   : > { %v467_v35 = vpop.xlane.xlu1 %466 }
 0x320   : > { %v468_v36 = vsub.f32 %v463_v33, %v467_v35 }
 0x322   : > { %v469_v37 = vmul.f32 1.442695, %v468_v36 }
 0x324   : > { %649 = vpow2.f32 %v469_v37 }
 0x32e   : > { %v650_v38 = vpop.eup %649 }
 0x32f   : > { %v471_v39 = vsel %vm464_vm6, %v650_v38, 0.0 }
 0x330   : > { %472 = vadd.xlane.f32.xlu1 %v471_v39 }
 0x3bd   : > { %v473_v40 = vpop.xlane.xlu1 %472 }
 0x3be   : > { %651 = vrcp.f32 %v473_v40 }
 0x3c8   : > { %v652_v41 = vpop.eup %651 }
 0x3c9   : > { %v475_v42 = vmul.f32 %v652_v41, %v650_v38 }
 0x3cb   : > { %476 = vst.msk [vmem:[#allocation7] sm:$0x3] %vm464_vm6, %v475_v42 }
 0x3cc PF: > { %p924_p7 = scmp.eq.s32.totalorder %s549_s0, 1  ;;  %s772_s29 = smov [#allocation7]  }
 0x3cd   : > { %s486_s7 = sshll.u32 %s772_s29, 4  ;;  %s487_s7 = int_to_ptr.vmem [resolvable:$true] %s486_s7 }
 0x3ce   : > { %s683_s8 = scalar_lea.vmem %s487_s7, 32  ;;  %p690_p11 = scmp.lt.s32.totalorder %s487_s7, %s487_s7 }
 0x3cf   : > { %p684_p5 = scmp.ne.s32.totalorder %s487_s7, %s683_s8  ;;  %p691_p13 = scmp.lt.s32.totalorder %s683_s8, %s683_s8 }
 0x3d1   : > { %p685_p6 = pnand %p684_p5, %p924_p7  ;;  %p692_p1 = por %p691_p13, %p690_p11 }
 0x3d3   : > { %p686_p8 = pneg %p685_p6 }
 0x3d5   : > { %p693_p2 = pnand %p692_p1, %p686_p8 }
 0x3d7   : > { %696 = shalt.err (!%p693_p2)
}
 0x3d8   : > { %s697_s0 = scalar_lea.hbm %s973_s5, 32 }
 0x3d9   : > { %p698_p3 = scmp.ne.s32.totalorder %s973_s5, %s697_s0  ;;  %p703_p4 = scmp.lt.u32.totalorder %s697_s0, %s973_s5 }
 0x3db   : > { %p699_p12 = pnand %p698_p3, %p924_p7 }
 0x3dd   : > { %p700_p0 = pneg %p699_p12 }
 0x3df   : > { %p705_p10 = pnand %p703_p4, %p700_p0 }
 0x3e1   : > { %708 = shalt.err (!%p705_p10)
}
 0x3e2   : > { %584 = dma.vmem_to_hbm [thread:$0]  (%p924_p7), %s487_s7, 32, %s973_s5, [#allocation6]  }
 0x3e3   : > { %738 = dma.done.wait (%p924_p7), [#allocation6], 32  }
 0x3e4   : > { %740 = vsyncadd (%p924_p7), [#allocation6], 4294967264 }
 0x3e5 PF: > { %s20_s25 = sadd.s32 1, %s763_s25   ;;  %s979_s20 = smov %s747_s21 }
 0x3e6   : > { %p17_p9 = scmp.ge.s32.totalorder %s20_s25, 4   ;;  %s980_s21 = smov %s751_s22 }
 0x3e7   : > { %s981_s22 = smov %s857_s6  ;;  %s982_s23 = smov %s759_s24 }
 0x3e8   : > { %s983_s24 = smov %s985_s26  ;;  %19 = sbr.rel (!%p17_p9) target bundleno = 7 (0x7), region = 86 }
 0x3ef   :  { %499 = vsyncpa [#allocation5], 1 }
 0x3f0   :  { %501 = vsyncpa [#allocation5 + $0x1], 1 }
 0x3f1   :  { %502 = vsyncpa [#allocation6], 1 }
 0x3f2   :  { %504 = vsyncpa [#allocation6 + $0x1], 1 }

</bundles_post_ra>
